<compile_context>
chip_gen: v5e
topology: v5e:2x2
jax: 0.10.0
libtpu: 0.0.40
codegen_flags: <defaults>
</compile_context>

<pallas_src>
import jax
import jax.numpy as jnp
from jax.experimental import pallas as pl
from jax.experimental.pallas import tpu as pltpu


# ----------------------------- model constants -----------------------------

IN_SHAPE = (3, 32, 32)
NIN = IN_SHAPE[0] * IN_SHAPE[1] * IN_SHAPE[2]   # 3072
HIDDEN = 128
NCLASSES = 10
LANE = 128
SUBLANE = 8
MAX_TILE_M = 256


def _round_up(x, m):
    return ((x + m - 1) // m) * m


# ------------------------------ Pallas kernel -------------------------------

def _mlp_fused_kernel(x_ref, w1_ref, b1_ref, w2_ref, b2_ref, o_ref):
    """Fused Linear(3072,128) + ReLU + Linear(128,10->padded 128).

    x:  (tm, 3072) f32   (cast to bf16 in-kernel for the MXU)
    w1: (3072, 128) bf16
    b1: (1, 128)    f32
    w2: (128, 128)  bf16 (columns >= 10 are zero padding -> lane-dense output)
    b2: (1, 128)    f32  (entries >= 10 are zero)
    o:  (tm, 128)   f32
    """
    x = x_ref[...].astype(jnp.bfloat16)
    h = jnp.dot(x, w1_ref[...], preferred_element_type=jnp.float32)
    h = jnp.maximum(h + b1_ref[...], 0.0)                 # ReLU, f32
    o = jnp.dot(h.astype(jnp.bfloat16), w2_ref[...],
                preferred_element_type=jnp.float32)
    o_ref[...] = (o + b2_ref[...]).astype(o_ref.dtype)


# ------------------------------ parameters ----------------------------------

def init_params(key):
    """Deterministic init, same tensor shapes as the PyTorch module."""
    k1, k2, k3, k4 = jax.random.split(key, 4)

    def uniform(k, shape, fan_in):
        bound = 1.0 / float(fan_in) ** 0.5
        return jax.random.uniform(k, shape, jnp.float32, -bound, bound)

    return {
        # nn.Linear(3072, 128)
        "fc1_w": uniform(k1, (HIDDEN, NIN), NIN),
        "fc1_b": uniform(k2, (HIDDEN,), NIN),
        # nn.Linear(128, 10)
        "fc2_w": uniform(k3, (NCLASSES, HIDDEN), HIDDEN),
        "fc2_b": uniform(k4, (NCLASSES,), HIDDEN),
    }


def pack_params(p):
    """One-time layout work: transpose to (K,N), pad fc2 to 128 lanes, cast to bf16."""
    w1 = jnp.asarray(p["fc1_w"]).T.astype(jnp.bfloat16)                 # (3072, 128)
    b1 = jnp.asarray(p["fc1_b"]).reshape(1, HIDDEN).astype(jnp.float32)  # (1, 128)
    w2 = jnp.zeros((HIDDEN, LANE), jnp.bfloat16)
    w2 = w2.at[:, :NCLASSES].set(jnp.asarray(p["fc2_w"]).T.astype(jnp.bfloat16))
    b2 = jnp.zeros((1, LANE), jnp.float32)
    b2 = b2.at[0, :NCLASSES].set(jnp.asarray(p["fc2_b"]).astype(jnp.float32))
    return {"w1": w1, "b1": b1, "w2": w2, "b2": b2}


# ------------------------------ forward --------------------------------------

def svhn_mlp_forward(x_nchw, packed):
    """x_nchw: (B, 3, 32, 32) float32 -> logits (B, 10)."""
    B = x_nchw.shape[0]
    # torch.flatten(x, start_dim=1): NCHW row-major flatten == plain reshape.
    xf = x_nchw.reshape(B, NIN).astype(jnp.float32)

    # Pick an M tile (multiple of 8 sublanes, capped for VMEM / pipelining),
    # pad the batch up to a whole number of tiles.
    tm = min(MAX_TILE_M, _round_up(B, SUBLANE))
    m_pad = _round_up(B, tm)
    if m_pad != B:
        xf = jnp.pad(xf, ((0, m_pad - B), (0, 0)))

    grid = (m_pad // tm,)

    out = pl.pallas_call(
        _mlp_fused_kernel,
        out_shape=jax.ShapeDtypeStruct((m_pad, LANE), jnp.float32),
        grid_spec=pltpu.PrefetchScalarGridSpec(
            num_scalar_prefetch=0,
            grid=grid,
            in_specs=[
                pl.BlockSpec((tm, NIN), lambda i: (i, 0)),      # x tile
                pl.BlockSpec((NIN, LANE), lambda i: (0, 0)),    # w1 (resident)
                pl.BlockSpec((1, LANE), lambda i: (0, 0)),      # b1
                pl.BlockSpec((LANE, LANE), lambda i: (0, 0)),   # w2 (padded)
                pl.BlockSpec((1, LANE), lambda i: (0, 0)),      # b2 (padded)
            ],
            out_specs=pl.BlockSpec((tm, LANE), lambda i: (i, 0)),
        ),
        compiler_params=pltpu.CompilerParams(
            dimension_semantics=("parallel",),   # megacore-shardable on v7x
        ),
    )(xf, packed["w1"], packed["b1"], packed["w2"], packed["b2"])

    return out[:B, :NCLASSES]


# ------------------------------ reference (sanity) ---------------------------

def _reference_forward(x_nchw, p):
    xf = x_nchw.reshape(x_nchw.shape[0], NIN).astype(jnp.float32)
    h = jnp.maximum(xf @ p["fc1_w"].T + p["fc1_b"], 0.0)
    return h @ p["fc2_w"].T + p["fc2_b"]


if __name__ == "__main__":
    key = jax.random.PRNGKey(0)
    k_params, k_x = jax.random.split(key)

    params = init_params(k_params)
    packed = pack_params(params)

    # Input shape implied by in_shape=(3, 32, 32); small batch of 2.
    x = jax.random.normal(k_x, (2, 3, 32, 32), dtype=jnp.float32)

    logits = svhn_mlp_forward(x, packed)
    jax.block_until_ready(logits)

    assert logits.shape == (2, NCLASSES), logits.shape
    assert bool(jnp.all(jnp.isfinite(logits)))

    # Loose tolerance: kernel uses bf16 MXU inputs with f32 accumulation.
    ref = _reference_forward(x, params)
    assert float(jnp.max(jnp.abs(logits - ref))) < 6e-2

    print("KERNEL_OK")
</pallas_src>

<mosaic_0001>
module attributes {stable_mosaic.version = 11 : i64} {
  func.func @_mlp_fused_kernel(%arg0: i32, %arg1: memref<8x3072xf32, #tpu.memory_space<vmem>>, %arg2: memref<3072x128xbf16, #tpu.memory_space<vmem>>, %arg3: memref<1x128xf32, #tpu.memory_space<vmem>>, %arg4: memref<128x128xbf16, #tpu.memory_space<vmem>>, %arg5: memref<1x128xf32, #tpu.memory_space<vmem>>, %arg6: memref<8x128xf32, #tpu.memory_space<vmem>>) attributes {dimension_semantics = [#tpu.dimension_semantics<parallel>], iteration_bounds = array<i64: 1>, scalar_prefetch = 0 : i64, scratch_operands = 0 : i64, tpu.core_type = #tpu.core_type<tc>, window_params = [{transform_indices = @transform_0, window_bounds = array<i64: 8, 3072>}, {pipeline_mode = #tpu.pipeline_mode<synchronous>, transform_indices = @transform_1, window_bounds = array<i64: 3072, 128>}, {pipeline_mode = #tpu.pipeline_mode<synchronous>, transform_indices = @transform_2, window_bounds = array<i64: 1, 128>}, {pipeline_mode = #tpu.pipeline_mode<synchronous>, transform_indices = @transform_3, window_bounds = array<i64: 128, 128>}, {pipeline_mode = #tpu.pipeline_mode<synchronous>, transform_indices = @transform_4, window_bounds = array<i64: 1, 128>}, {transform_indices = @transform_5, window_bounds = array<i64: 8, 128>}]} {
    %c0 = arith.constant 0 : index
    %c0_0 = arith.constant 0 : index
    %0 = vector.load %arg1[%c0, %c0_0] : memref<8x3072xf32, #tpu.memory_space<vmem>>, vector<8x3072xf32>
    %1 = arith.truncf %0 : vector<8x3072xf32> to vector<8x3072xbf16>
    %c0_1 = arith.constant 0 : index
    %c0_2 = arith.constant 0 : index
    %2 = vector.load %arg2[%c0_1, %c0_2] : memref<3072x128xbf16, #tpu.memory_space<vmem>>, vector<3072x128xbf16>
    %cst = arith.constant dense<0.000000e+00> : vector<8x128xf32>
    %3 = tpu.matmul %1, %2, %cst {dimension_numbers = #tpu.dot_dimension_numbers<[1], [0], [0], [1], [0, 0, 1, 1], [], []>} : vector<8x3072xbf16>, vector<3072x128xbf16>, vector<8x128xf32> -> vector<8x128xf32>
    %c0_3 = arith.constant 0 : index
    %c0_4 = arith.constant 0 : index
    %4 = vector.load %arg3[%c0_3, %c0_4] : memref<1x128xf32, #tpu.memory_space<vmem>>, vector<1x128xf32>
    %5 = vector.broadcast %4 : vector<1x128xf32> to vector<8x128xf32>
    %6 = arith.addf %3, %5 : vector<8x128xf32>
    %cst_5 = arith.constant 0.000000e+00 : f32
    %7 = vector.broadcast %cst_5 : f32 to vector<8x128xf32>
    %8 = arith.maximumf %6, %7 : vector<8x128xf32>
    %9 = arith.truncf %8 : vector<8x128xf32> to vector<8x128xbf16>
    %c0_6 = arith.constant 0 : index
    %c0_7 = arith.constant 0 : index
    %10 = vector.load %arg4[%c0_6, %c0_7] : memref<128x128xbf16, #tpu.memory_space<vmem>>, vector<128x128xbf16>
    %cst_8 = arith.constant dense<0.000000e+00> : vector<8x128xf32>
    %11 = tpu.matmul %9, %10, %cst_8 {dimension_numbers = #tpu.dot_dimension_numbers<[1], [0], [0], [1], [0, 0, 1, 1], [], []>} : vector<8x128xbf16>, vector<128x128xbf16>, vector<8x128xf32> -> vector<8x128xf32>
    %c0_9 = arith.constant 0 : index
    %c0_10 = arith.constant 0 : index
    %12 = vector.load %arg5[%c0_9, %c0_10] : memref<1x128xf32, #tpu.memory_space<vmem>>, vector<1x128xf32>
    %13 = vector.broadcast %12 : vector<1x128xf32> to vector<8x128xf32>
    %14 = arith.addf %11, %13 : vector<8x128xf32>
    %c0_11 = arith.constant 0 : index
    %c0_12 = arith.constant 0 : index
    %15 = vector.load %arg6[%c0_11, %c0_12] : memref<8x128xf32, #tpu.memory_space<vmem>>, vector<8x128xf32>
    tpu.vector_store %arg6[%c0_11, %c0_12], %14 {strides = array<i32>} : memref<8x128xf32, #tpu.memory_space<vmem>>, vector<8x128xf32>,
    return
  }
  func.func @transform_0(%arg0: i32) -> (i32, i32) {
    %c0_i32 = arith.constant 0 : i32
    %c0_i32_0 = arith.constant 0 : i32
    return %arg0, %c0_i32 : i32, i32
  }
  func.func @transform_1(%arg0: i32) -> (i32, i32) {
    %c0_i32 = arith.constant 0 : i32
    %c0_i32_0 = arith.constant 0 : i32
    %c0_i32_1 = arith.constant 0 : i32
    return %c0_i32, %c0_i32_0 : i32, i32
  }
  func.func @transform_2(%arg0: i32) -> (i32, i32) {
    %c0_i32 = arith.constant 0 : i32
    %c0_i32_0 = arith.constant 0 : i32
    %c0_i32_1 = arith.constant 0 : i32
    return %c0_i32, %c0_i32_0 : i32, i32
  }
  func.func @transform_3(%arg0: i32) -> (i32, i32) {
    %c0_i32 = arith.constant 0 : i32
    %c0_i32_0 = arith.constant 0 : i32
    %c0_i32_1 = arith.constant 0 : i32
    return %c0_i32, %c0_i32_0 : i32, i32
  }
  func.func @transform_4(%arg0: i32) -> (i32, i32) {
    %c0_i32 = arith.constant 0 : i32
    %c0_i32_0 = arith.constant 0 : i32
    %c0_i32_1 = arith.constant 0 : i32
    return %c0_i32, %c0_i32_0 : i32, i32
  }
  func.func @transform_5(%arg0: i32) -> (i32, i32) {
    %c0_i32 = arith.constant 0 : i32
    %c0_i32_0 = arith.constant 0 : i32
    return %arg0, %c0_i32 : i32, i32
  }
}

</mosaic_0001>

<bundles_post_ra>
// kernel: tpu_custom_call.1
= control target key start
LH: loop header
LB: loop body
LE: loop exit
PB: predicated region body
PF: predicated region fallthrough
CT: control target
= control target key end

     0   :  { %10 = vsyncpa [#allocation3], 0  ;;  %s3232_s0 = inlined_call_operand.hbm [shape: f32[8,3072], index: 0, kind: input, shape index: {}]   ;;  %s3233_s1 = inlined_call_operand.hbm [shape: bf16[3072,128], index: 1, kind: input, shape index: {}]   ;;  %s3234_s2 = inlined_call_operand.vmem [shape: f32[1,128], index: 2, kind: input, shape index: {}]   ;;  %s3235_s3 = inlined_call_operand.hbm [shape: bf16[128,128], index: 3, kind: input, shape index: {}]   ;;  %s3236_s4 = inlined_call_operand.vmem [shape: f32[1,128], index: 4, kind: input, shape index: {}]   ;;  %s3237_s5 = inlined_call_operand.hbm [shape: f32[8,128], index: 5, kind: output, shape index: {}]  }
   0x1   :  { %11 = vsyncpa [#allocation6], 0  ;;  %s28_s20 = sshll.u32 %s3233_s1, 4  ;;  %s29_s20 = int_to_ptr.hbm [resolvable:$true] %s28_s20 }
   0x2   :  { %12 = vsyncpa [#allocation4], 0  ;;  %s3178_s21 = smov [#allocation5]   ;;  %s18_s25 = sshll.u32 %s3232_s0, 4  ;;  %s19_s25 = int_to_ptr.hbm [resolvable:$true] %s18_s25 }
   0x3   :  { %s30_s22 = sshll.u32 %s3178_s21, 4  ;;  %s3179_s26 = smov 64   ;;  %s31_s22 = int_to_ptr.vmem [resolvable:$true] %s30_s22 }
   0x4   :  { %s3180_s27 = smov 4   ;;  %s3181_s28 = smov [#allocation2]  }
   0x5   :  { %36 = dma.hbm_to_vmem [thread:$0]  %s29_s20, 24576, %s31_s22, [#allocation6], %s3179_s26, %s3179_s26, %s3180_s27  }
   0x6   :  { %s20_s29 = sshll.u32 %s3181_s28, 4  ;;  %s43_s7 = sshll.u32 %s3235_s3, 4  ;;  %s21_s29 = int_to_ptr.vmem [resolvable:$true] %s20_s29  ;;  %s44_s7 = int_to_ptr.hbm [resolvable:$true] %s43_s7 }
   0x7   :  { %23 = dma.hbm_to_vmem [thread:$0]  %s19_s25, 3072, %s21_s29, [#allocation3]  }
   0x8   :  { %s3182_s1 = smov [#allocation7]  }
   0x9   :  { %s45_s8 = sshll.u32 %s3182_s1, 4  ;;  %s46_s8 = int_to_ptr.vmem [resolvable:$true] %s45_s8 }
   0xa   :  { %51 = dma.hbm_to_vmem [thread:$0]  %s44_s7, 1024, %s46_s8, [#allocation6], %s3179_s26, %s3179_s26, %s3180_s27  }
   0xb   :  { %3172 = dma.done.wait [#allocation3], 3072  }
   0xc   :  { %3173 = vsyncadd [#allocation3], 4294964224 }
   0xd   :  { %3174 = dma.done.wait [#allocation6], 25600  }
   0xe   :  { %3175 = vsyncadd [#allocation6], 4294941696  ;;  %v2875_v0 = vld [vmem:[#allocation5 + $0x38] sm:$0xff]  ;;  %v2874_v4 = vld [vmem:[#allocation5 + $0x30] sm:$0xff]  ;;  %s3183_s10 = smov [#allocation8]   ;;  %s2057_s14 = sshll.u32 %s3237_s5, 4  ;;  %s2058_s14 = int_to_ptr.hbm [resolvable:$true] %s2057_s14 }
   0xf   :  { %v2883_v1 = vld [vmem:[#allocation5 + $0x78] sm:$0xff]  ;;  %1654 = vmatpush.bf16.msra.mxu0 %v2875_v0  ;;  %v2882_v5 = vld [vmem:[#allocation5 + $0x70] sm:$0xff]  ;;  %v2873_v8 = vld [vmem:[#allocation5 + $0x28] sm:$0xff]  ;;  %s2055_s11 = sshll.u32 %s3183_s10, 4  ;;  %s2056_s11 = int_to_ptr.vmem [resolvable:$true] %s2055_s11 }
  0x10   :  { %v2891_v2 = vld [vmem:[#allocation5 + $0xb8] sm:$0xff]  ;;  %1667 = vmatpush.bf16.msra.mxu1 %v2883_v1  ;;  %v2890_v6 = vld [vmem:[#allocation5 + $0xb0] sm:$0xff]  ;;  %v2881_v9 = vld [vmem:[#allocation5 + $0x68] sm:$0xff] }
  0x11   :  { %v2899_v3 = vld [vmem:[#allocation5 + $0xf8] sm:$0xff]  ;;  %1680 = vmatpush.bf16.msra.mxu2 %v2891_v2  ;;  %v2898_v7 = vld [vmem:[#allocation5 + $0xf0] sm:$0xff]  ;;  %v2889_v10 = vld [vmem:[#allocation5 + $0xa8] sm:$0xff] }
  0x12   :  { %1693 = vmatpush.bf16.msra.mxu3 %v2899_v3  ;;  %v2897_v11 = vld [vmem:[#allocation5 + $0xe8] sm:$0xff]  ;;  %v2872_v12 = vld [vmem:[#allocation5 + $0x20] sm:$0xff]  ;;  %v2871_v16 = vld [vmem:[#allocation5 + $0x18] sm:$0xff] }
  0x13   :  { %1655 = vmatpush.bf16.msra.mxu0 %v2874_v4  ;;  %v2880_v13 = vld [vmem:[#allocation5 + $0x60] sm:$0xff]  ;;  %v2879_v17 = vld [vmem:[#allocation5 + $0x58] sm:$0xff]  ;;  %v2870_v20 = vld [vmem:[#allocation5 + $0x10] sm:$0xff] }
  0x14   :  { %1668 = vmatpush.bf16.msra.mxu1 %v2882_v5  ;;  %v2888_v14 = vld [vmem:[#allocation5 + $0xa0] sm:$0xff]  ;;  %v2887_v18 = vld [vmem:[#allocation5 + $0x98] sm:$0xff]  ;;  %v2878_v21 = vld [vmem:[#allocation5 + $0x50] sm:$0xff] }
  0x15   :  { %1681 = vmatpush.bf16.msra.mxu2 %v2890_v6  ;;  %v2896_v15 = vld [vmem:[#allocation5 + $0xe0] sm:$0xff]  ;;  %v2895_v19 = vld [vmem:[#allocation5 + $0xd8] sm:$0xff]  ;;  %v2886_v22 = vld [vmem:[#allocation5 + $0x90] sm:$0xff] }
  0x16   :  { %1694 = vmatpush.bf16.msra.mxu3 %v2898_v7  ;;  %v2894_v23 = vld [vmem:[#allocation5 + $0xd0] sm:$0xff]  ;;  %v2869_v24 = vld [vmem:[#allocation5 + $0x8] sm:$0xff]  ;;  %v2868_v28 = vld [vmem:[#allocation5] sm:$0xff] }
  0x17   :  { %1656 = vmatpush.bf16.msra.mxu0 %v2873_v8  ;;  %v2877_v25 = vld [vmem:[#allocation5 + $0x48] sm:$0xff]  ;;  %v2876_v29 = vld [vmem:[#allocation5 + $0x40] sm:$0xff]  ;;  %v2907_v32 = vld [vmem:[#allocation5 + $0x138] sm:$0xff] }
  0x18   :  { %1669 = vmatpush.bf16.msra.mxu1 %v2881_v9  ;;  %v2885_v26 = vld [vmem:[#allocation5 + $0x88] sm:$0xff]  ;;  %v2884_v30 = vld [vmem:[#allocation5 + $0x80] sm:$0xff]  ;;  %v68_v33 = vld [vmem:[#allocation2 + $0x10] sm:$0xff] }
  0x19   :  { %1682 = vmatpush.bf16.msra.mxu2 %v2889_v10  ;;  %v2893_v27 = vld [vmem:[#allocation5 + $0xc8] sm:$0xff]  ;;  %v2892_v31 = vld [vmem:[#allocation5 + $0xc0] sm:$0xff]  ;;  %v2915_v35 = vld [vmem:[#allocation5 + $0x178] sm:$0xff]  ;;  %v92_v40 = vpack.c.bf16 %v68_v33, %v68_v33 }
  0x1a   :  { %1695 = vmatpush.bf16.msra.mxu3 %v2897_v11  ;;  %v66_v34 = vld [vmem:[#allocation2] sm:$0xff]  ;;  %v69_v36 = vld [vmem:[#allocation2 + $0x18] sm:$0xff]  ;;  %v67_v37 = vld [vmem:[#allocation2 + $0x8] sm:$0xff] }
  0x1b   :  { %1657 = vmatpush.bf16.msra.mxu0 %v2872_v12  ;;  %v2923_v38 = vld [vmem:[#allocation5 + $0x1b8] sm:$0xff]  ;;  %v90_v41 = vpack.c.bf16 %v66_v34, %v66_v34  ;;  %v93_v42 = vpack.c.bf16 %v69_v36, %v69_v36  ;;  %v91_v43 = vpack.c.bf16 %v67_v37, %v67_v37  ;;  %v2906_v44 = vld [vmem:[#allocation5 + $0x130] sm:$0xff]  ;;  %v2905_v48 = vld [vmem:[#allocation5 + $0x128] sm:$0xff] }
  0x1c   :  { %1670 = vmatpush.bf16.msra.mxu1 %v2880_v13  ;;  %v2931_v39 = vld [vmem:[#allocation5 + $0x1f8] sm:$0xff]  ;;  %v2914_v45 = vld [vmem:[#allocation5 + $0x170] sm:$0xff]  ;;  %v2913_v49 = vld [vmem:[#allocation5 + $0x168] sm:$0xff] }
  0x1d   :  { %1683 = vmatpush.bf16.msra.mxu2 %v2888_v14  ;;  %v2922_v46 = vld [vmem:[#allocation5 + $0x1b0] sm:$0xff]  ;;  %v2921_v50 = vld [vmem:[#allocation5 + $0x1a8] sm:$0xff]  ;;  %v2904_v52 = vld [vmem:[#allocation5 + $0x120] sm:$0xff] }
  0x1e   :  { %1696 = vmatpush.bf16.msra.mxu3 %v2896_v15  ;;  %v2930_v47 = vld [vmem:[#allocation5 + $0x1f0] sm:$0xff]  ;;  %v2929_v51 = vld [vmem:[#allocation5 + $0x1e8] sm:$0xff]  ;;  %v2912_v53 = vld [vmem:[#allocation5 + $0x160] sm:$0xff] }
  0x1f   :  { %1658 = vmatpush.bf16.msra.mxu0 %v2871_v16  ;;  %v2920_v54 = vld [vmem:[#allocation5 + $0x1a0] sm:$0xff]  ;;  %v2903_v56 = vld [vmem:[#allocation5 + $0x118] sm:$0xff]  ;;  %v2902_v60 = vld [vmem:[#allocation5 + $0x110] sm:$0xff] }
  0x20   :  { %1671 = vmatpush.bf16.msra.mxu1 %v2879_v17  ;;  %v2928_v55 = vld [vmem:[#allocation5 + $0x1e0] sm:$0xff]  ;;  %v2911_v57 = vld [vmem:[#allocation5 + $0x158] sm:$0xff]  ;;  %v2910_v61 = vld [vmem:[#allocation5 + $0x150] sm:$0xff] }
  0x21   :  { %1684 = vmatpush.bf16.msra.mxu2 %v2887_v18  ;;  %v2919_v58 = vld [vmem:[#allocation5 + $0x198] sm:$0xff]  ;;  %v2918_v62 = vld [vmem:[#allocation5 + $0x190] sm:$0xff]  ;;  %v2901_v0 = vld [vmem:[#allocation5 + $0x108] sm:$0xff] }
  0x22   :  { %1697 = vmatpush.bf16.msra.mxu3 %v2895_v19  ;;  %v2927_v59 = vld [vmem:[#allocation5 + $0x1d8] sm:$0xff]  ;;  %v2926_v63 = vld [vmem:[#allocation5 + $0x1d0] sm:$0xff]  ;;  %v2909_v1 = vld [vmem:[#allocation5 + $0x148] sm:$0xff] }
  0x23   :  { %1659 = vmatpush.bf16.msra.mxu0 %v2870_v20  ;;  %v2917_v2 = vld [vmem:[#allocation5 + $0x188] sm:$0xff]  ;;  %v2900_v4 = vld [vmem:[#allocation5 + $0x100] sm:$0xff]  ;;  %v2939_v8 = vld [vmem:[#allocation5 + $0x238] sm:$0xff] }
  0x24   :  { %1672 = vmatpush.bf16.msra.mxu1 %v2878_v21  ;;  %v2925_v3 = vld [vmem:[#allocation5 + $0x1c8] sm:$0xff]  ;;  %v2908_v5 = vld [vmem:[#allocation5 + $0x140] sm:$0xff]  ;;  %v72_v9 = vld [vmem:[#allocation2 + $0x30] sm:$0xff] }
  0x25   :  { %1685 = vmatpush.bf16.msra.mxu2 %v2886_v22  ;;  %v2916_v6 = vld [vmem:[#allocation5 + $0x180] sm:$0xff]  ;;  %v2947_v11 = vld [vmem:[#allocation5 + $0x278] sm:$0xff]  ;;  %v71_v13 = vld [vmem:[#allocation2 + $0x28] sm:$0xff]  ;;  %v96_v16 = vpack.c.bf16 %v72_v9, %v72_v9 }
  0x26   :  { %1698 = vmatpush.bf16.msra.mxu3 %v2894_v23  ;;  %v2924_v7 = vld [vmem:[#allocation5 + $0x1c0] sm:$0xff]  ;;  %v73_v12 = vld [vmem:[#allocation2 + $0x38] sm:$0xff]  ;;  %v95_v19 = vpack.c.bf16 %v71_v13, %v71_v13  ;;  %v2938_v20 = vld [vmem:[#allocation5 + $0x230] sm:$0xff] }
  0x27   :  { %1660 = vmatpush.bf16.msra.mxu0 %v2869_v24  ;;  %v70_v10 = vld [vmem:[#allocation2 + $0x20] sm:$0xff]  ;;  %v2955_v14 = vld [vmem:[#allocation5 + $0x2b8] sm:$0xff]  ;;  %v97_v18 = vpack.c.bf16 %v73_v12, %v73_v12  ;;  %v2946_v21 = vld [vmem:[#allocation5 + $0x270] sm:$0xff] }
  0x28   :  { %1673 = vmatpush.bf16.msra.mxu1 %v2877_v25  ;;  %v2963_v15 = vld [vmem:[#allocation5 + $0x2f8] sm:$0xff]  ;;  %v94_v17 = vpack.c.bf16 %v70_v10, %v70_v10  ;;  %v2954_v22 = vld [vmem:[#allocation5 + $0x2b0] sm:$0xff]  ;;  %v2937_v24 = vld [vmem:[#allocation5 + $0x228] sm:$0xff] }
  0x29   :  { %1686 = vmatpush.bf16.msra.mxu2 %v2885_v26  ;;  %v2962_v23 = vld [vmem:[#allocation5 + $0x2f0] sm:$0xff]  ;;  %v2945_v25 = vld [vmem:[#allocation5 + $0x268] sm:$0xff]  ;;  %v2943_v33 = vld [vmem:[#allocation5 + $0x258] sm:$0xff] }
  0x2a   :  { %1699 = vmatpush.bf16.msra.mxu3 %v2893_v27  ;;  %v2953_v26 = vld [vmem:[#allocation5 + $0x2a8] sm:$0xff]  ;;  %v2951_v34 = vld [vmem:[#allocation5 + $0x298] sm:$0xff]  ;;  %v2934_v36 = vld [vmem:[#allocation5 + $0x210] sm:$0xff] }
  0x2b   :  { %1661 = vmatpush.bf16.msra.mxu0 %v2868_v28  ;;  %v2961_v27 = vld [vmem:[#allocation5 + $0x2e8] sm:$0xff]  ;;  %v2936_v28 = vld [vmem:[#allocation5 + $0x220] sm:$0xff]  ;;  %v2942_v37 = vld [vmem:[#allocation5 + $0x250] sm:$0xff] }
  0x2c   :  { %1674 = vmatpush.bf16.msra.mxu1 %v2876_v29  ;;  %v2944_v29 = vld [vmem:[#allocation5 + $0x260] sm:$0xff]  ;;  %v2975_v9 = vld [vmem:[#allocation5 + $0x358] sm:$0xff]  ;;  %v2966_v12 = vld [vmem:[#allocation5 + $0x310] sm:$0xff] }
  0x2d   :  { %1687 = vmatpush.bf16.msra.mxu2 %v2884_v30  ;;  %v2952_v30 = vld [vmem:[#allocation5 + $0x2a0] sm:$0xff]  ;;  %v2983_v10 = vld [vmem:[#allocation5 + $0x398] sm:$0xff]  ;;  %v2974_v13 = vld [vmem:[#allocation5 + $0x350] sm:$0xff] }
  0x2e   :  { %1700 = vmatpush.bf16.msra.mxu3 %v2892_v31  ;;  %1662 = vmatmul.bf16.vlgmr.msra.gmra.mxu0 %v90_v41  ;;  %v2960_v31 = vld [vmem:[#allocation5 + $0x2e0] sm:$0xff]  ;;  %v2941_v41 = vld [vmem:[#allocation5 + $0x248] sm:$0xff] }
  0x2f   :  { %1706 = vmatpush.bf16.msrb.mxu0 %v2907_v32  ;;  %1675 = vmatmul.bf16.vlgmr.msra.gmra.mxu1 %v91_v43  ;;  %v2935_v32 = vld [vmem:[#allocation5 + $0x218] sm:$0xff]  ;;  %v2957_v43 = vld [vmem:[#allocation5 + $0x2c8] sm:$0xff] }
  0x30   :  { %1719 = vmatpush.bf16.msrb.mxu1 %v2915_v35  ;;  %1688 = vmatmul.bf16.vlgmr.msra.gmra.mxu2 %v92_v40  ;;  %v2959_v35 = vld [vmem:[#allocation5 + $0x2d8] sm:$0xff]  ;;  %v2933_v40 = vld [vmem:[#allocation5 + $0x208] sm:$0xff] }
  0x31   :  { %1732 = vmatpush.bf16.msrb.mxu2 %v2923_v38  ;;  %1701 = vmatmul.bf16.vlgmr.msra.gmra.mxu3 %v93_v42  ;;  %v2950_v38 = vld [vmem:[#allocation5 + $0x290] sm:$0xff]  ;;  %v2949_v42 = vld [vmem:[#allocation5 + $0x288] sm:$0xff] }
  0x32   :  { %1745 = vmatpush.bf16.msrb.mxu3 %v2931_v39  ;;  %v2958_v39 = vld [vmem:[#allocation5 + $0x2d0] sm:$0xff] }
  0x33   :  { %1707 = vmatpush.bf16.msrb.mxu0 %v2906_v44  ;;  %v2932_v44 = vld [vmem:[#allocation5 + $0x200] sm:$0xff] }
  0x34   :  { %1720 = vmatpush.bf16.msrb.mxu1 %v2914_v45  ;;  %v2940_v45 = vld [vmem:[#allocation5 + $0x240] sm:$0xff] }
  0x35   :  { %1733 = vmatpush.bf16.msrb.mxu2 %v2922_v46  ;;  %v2948_v46 = vld [vmem:[#allocation5 + $0x280] sm:$0xff] }
  0x36   :  { %1746 = vmatpush.bf16.msrb.mxu3 %v2930_v47  ;;  %v2956_v47 = vld [vmem:[#allocation5 + $0x2c0] sm:$0xff] }
  0x37   :  { %1708 = vmatpush.bf16.msrb.mxu0 %v2905_v48  ;;  %v2971_v48 = vld [vmem:[#allocation5 + $0x338] sm:$0xff] }
  0x38   :  { %1721 = vmatpush.bf16.msrb.mxu1 %v2913_v49  ;;  %v74_v49 = vld [vmem:[#allocation2 + $0x40] sm:$0xff] }
  0x39   :  { %1734 = vmatpush.bf16.msrb.mxu2 %v2921_v50  ;;  %v76_v50 = vld [vmem:[#allocation2 + $0x50] sm:$0xff] }
  0x3a   :  { %1747 = vmatpush.bf16.msrb.mxu3 %v2929_v51  ;;  %v2979_v51 = vld [vmem:[#allocation5 + $0x378] sm:$0xff] }
  0x3b   :  { %1709 = vmatpush.bf16.msrb.mxu0 %v2904_v52  ;;  %v75_v52 = vld [vmem:[#allocation2 + $0x48] sm:$0xff] }
  0x3c   :  { %1722 = vmatpush.bf16.msrb.mxu1 %v2912_v53  ;;  %v77_v53 = vld [vmem:[#allocation2 + $0x58] sm:$0xff] }
  0x3d   :  { %1735 = vmatpush.bf16.msrb.mxu2 %v2920_v54  ;;  %v2987_v54 = vld [vmem:[#allocation5 + $0x3b8] sm:$0xff] }
  0x3e   :  { %1748 = vmatpush.bf16.msrb.mxu3 %v2928_v55  ;;  %v2995_v55 = vld [vmem:[#allocation5 + $0x3f8] sm:$0xff] }
  0x3f   :  { %1710 = vmatpush.bf16.msrb.mxu0 %v2903_v56  ;;  %v98_v56 = vpack.c.bf16 %v74_v49, %v74_v49  ;;  %v3007_v49 = vld [vmem:[#allocation5 + $0x458] sm:$0xff] }
  0x40   :  { %1723 = vmatpush.bf16.msrb.mxu1 %v2911_v57  ;;  %v100_v57 = vpack.c.bf16 %v76_v50, %v76_v50  ;;  %v3015_v50 = vld [vmem:[#allocation5 + $0x498] sm:$0xff] }
  0x41   :  { %1736 = vmatpush.bf16.msrb.mxu2 %v2919_v58  ;;  %v99_v58 = vpack.c.bf16 %v75_v52, %v75_v52  ;;  %v2998_v52 = vld [vmem:[#allocation5 + $0x410] sm:$0xff] }
  0x42   :  { %1749 = vmatpush.bf16.msrb.mxu3 %v2927_v59  ;;  %v101_v59 = vpack.c.bf16 %v77_v53, %v77_v53  ;;  %v3006_v53 = vld [vmem:[#allocation5 + $0x450] sm:$0xff] }
  0x43   :  { %1711 = vmatpush.bf16.msrb.mxu0 %v2902_v60  ;;  %v2970_v60 = vld [vmem:[#allocation5 + $0x330] sm:$0xff] }
  0x44   :  { %1724 = vmatpush.bf16.msrb.mxu1 %v2910_v61  ;;  %v2978_v61 = vld [vmem:[#allocation5 + $0x370] sm:$0xff] }
  0x45   :  { %1737 = vmatpush.bf16.msrb.mxu2 %v2918_v62  ;;  %v2986_v62 = vld [vmem:[#allocation5 + $0x3b0] sm:$0xff] }
  0x46   :  { %1750 = vmatpush.bf16.msrb.mxu3 %v2926_v63  ;;  %v2994_v63 = vld [vmem:[#allocation5 + $0x3f0] sm:$0xff] }
  0x47   :  { %1712 = vmatpush.bf16.msrb.mxu0 %v2901_v0  ;;  %v2969_v0 = vld [vmem:[#allocation5 + $0x328] sm:$0xff] }
  0x48   :  { %1725 = vmatpush.bf16.msrb.mxu1 %v2909_v1  ;;  %v2977_v1 = vld [vmem:[#allocation5 + $0x368] sm:$0xff] }
  0x49   :  { %1738 = vmatpush.bf16.msrb.mxu2 %v2917_v2  ;;  %v2985_v2 = vld [vmem:[#allocation5 + $0x3a8] sm:$0xff] }
  0x4a   :  { %1751 = vmatpush.bf16.msrb.mxu3 %v2925_v3  ;;  %v2993_v3 = vld [vmem:[#allocation5 + $0x3e8] sm:$0xff] }
  0x4b   :  { %1713 = vmatpush.bf16.msrb.mxu0 %v2900_v4  ;;  %v2968_v4 = vld [vmem:[#allocation5 + $0x320] sm:$0xff] }
  0x4c   :  { %1726 = vmatpush.bf16.msrb.mxu1 %v2908_v5  ;;  %v2976_v5 = vld [vmem:[#allocation5 + $0x360] sm:$0xff] }
  0x4d   :  { %1739 = vmatpush.bf16.msrb.mxu2 %v2916_v6  ;;  %v2984_v6 = vld [vmem:[#allocation5 + $0x3a0] sm:$0xff] }
  0x4e   :  { %1752 = vmatpush.bf16.msrb.mxu3 %v2924_v7  ;;  %1714 = vmatmul.bf16.vlgmr.msrb.gmra.mxu0 %v94_v17  ;;  %v2992_v7 = vld [vmem:[#allocation5 + $0x3e0] sm:$0xff]  ;;  %v2973_v17 = vld [vmem:[#allocation5 + $0x348] sm:$0xff] }
  0x4f   :  { %1758 = vmatpush.bf16.msra.mxu0 %v2939_v8  ;;  %1727 = vmatmul.bf16.vlgmr.msrb.gmra.mxu1 %v95_v19  ;;  %v2967_v8 = vld [vmem:[#allocation5 + $0x318] sm:$0xff]  ;;  %v2989_v19 = vld [vmem:[#allocation5 + $0x3c8] sm:$0xff] }
  0x50   :  { %1771 = vmatpush.bf16.msra.mxu1 %v2947_v11  ;;  %1740 = vmatmul.bf16.vlgmr.msrb.gmra.mxu2 %v96_v16  ;;  %v2991_v11 = vld [vmem:[#allocation5 + $0x3d8] sm:$0xff]  ;;  %v2965_v16 = vld [vmem:[#allocation5 + $0x308] sm:$0xff] }
  0x51   :  { %1784 = vmatpush.bf16.msra.mxu2 %v2955_v14  ;;  %1753 = vmatmul.bf16.vlgmr.msrb.gmra.mxu3 %v97_v18  ;;  %v2982_v14 = vld [vmem:[#allocation5 + $0x390] sm:$0xff]  ;;  %v2981_v18 = vld [vmem:[#allocation5 + $0x388] sm:$0xff] }
  0x52   :  { %1797 = vmatpush.bf16.msra.mxu3 %v2963_v15  ;;  %v2990_v15 = vld [vmem:[#allocation5 + $0x3d0] sm:$0xff] }
  0x53   :  { %1759 = vmatpush.bf16.msra.mxu0 %v2938_v20  ;;  %v2964_v20 = vld [vmem:[#allocation5 + $0x300] sm:$0xff] }
  0x54   :  { %1772 = vmatpush.bf16.msra.mxu1 %v2946_v21  ;;  %v2972_v21 = vld [vmem:[#allocation5 + $0x340] sm:$0xff] }
  0x55   :  { %1785 = vmatpush.bf16.msra.mxu2 %v2954_v22  ;;  %v2980_v22 = vld [vmem:[#allocation5 + $0x380] sm:$0xff] }
  0x56   :  { %1798 = vmatpush.bf16.msra.mxu3 %v2962_v23  ;;  %v2988_v23 = vld [vmem:[#allocation5 + $0x3c0] sm:$0xff] }
  0x57   :  { %1760 = vmatpush.bf16.msra.mxu0 %v2937_v24  ;;  %v3003_v24 = vld [vmem:[#allocation5 + $0x438] sm:$0xff] }
  0x58   :  { %1773 = vmatpush.bf16.msra.mxu1 %v2945_v25  ;;  %v78_v25 = vld [vmem:[#allocation2 + $0x60] sm:$0xff] }
  0x59   :  { %1786 = vmatpush.bf16.msra.mxu2 %v2953_v26  ;;  %v80_v26 = vld [vmem:[#allocation2 + $0x70] sm:$0xff] }
  0x5a   :  { %1799 = vmatpush.bf16.msra.mxu3 %v2961_v27  ;;  %v3011_v27 = vld [vmem:[#allocation5 + $0x478] sm:$0xff] }
  0x5b   :  { %1761 = vmatpush.bf16.msra.mxu0 %v2936_v28  ;;  %v79_v28 = vld [vmem:[#allocation2 + $0x68] sm:$0xff] }
  0x5c   :  { %1774 = vmatpush.bf16.msra.mxu1 %v2944_v29  ;;  %v81_v29 = vld [vmem:[#allocation2 + $0x78] sm:$0xff] }
  0x5d   :  { %1787 = vmatpush.bf16.msra.mxu2 %v2952_v30  ;;  %v3019_v30 = vld [vmem:[#allocation5 + $0x4b8] sm:$0xff] }
  0x5e   :  { %1800 = vmatpush.bf16.msra.mxu3 %v2960_v31  ;;  %v3027_v31 = vld [vmem:[#allocation5 + $0x4f8] sm:$0xff] }
  0x5f   :  { %1762 = vmatpush.bf16.msra.mxu0 %v2935_v32  ;;  %v102_v32 = vpack.c.bf16 %v78_v25, %v78_v25 }
  0x60   :  { %1775 = vmatpush.bf16.msra.mxu1 %v2943_v33  ;;  %v104_v33 = vpack.c.bf16 %v80_v26, %v80_v26  ;;  %v3048_v26 = vld [vmem:[#allocation5 + $0x5a0] sm:$0xff] }
  0x61   :  { %1788 = vmatpush.bf16.msra.mxu2 %v2951_v34  ;;  %v103_v34 = vpack.c.bf16 %v79_v28, %v79_v28 }
  0x62   :  { %1801 = vmatpush.bf16.msra.mxu3 %v2959_v35  ;;  %v105_v35 = vpack.c.bf16 %v81_v29, %v81_v29  ;;  %v3031_v29 = vld [vmem:[#allocation5 + $0x518] sm:$0xff] }
  0x63   :  { %1763 = vmatpush.bf16.msra.mxu0 %v2934_v36  ;;  %v3002_v36 = vld [vmem:[#allocation5 + $0x430] sm:$0xff] }
  0x64   :  { %1776 = vmatpush.bf16.msra.mxu1 %v2942_v37  ;;  %v3010_v37 = vld [vmem:[#allocation5 + $0x470] sm:$0xff] }
  0x65   :  { %1789 = vmatpush.bf16.msra.mxu2 %v2950_v38  ;;  %v3018_v38 = vld [vmem:[#allocation5 + $0x4b0] sm:$0xff] }
  0x66   :  { %1802 = vmatpush.bf16.msra.mxu3 %v2958_v39  ;;  %v3026_v39 = vld [vmem:[#allocation5 + $0x4f0] sm:$0xff] }
  0x67   :  { %1764 = vmatpush.bf16.msra.mxu0 %v2933_v40  ;;  %v3001_v40 = vld [vmem:[#allocation5 + $0x428] sm:$0xff] }
  0x68   :  { %1777 = vmatpush.bf16.msra.mxu1 %v2941_v41  ;;  %v3009_v41 = vld [vmem:[#allocation5 + $0x468] sm:$0xff] }
  0x69   :  { %1790 = vmatpush.bf16.msra.mxu2 %v2949_v42  ;;  %v3017_v42 = vld [vmem:[#allocation5 + $0x4a8] sm:$0xff] }
  0x6a   :  { %1803 = vmatpush.bf16.msra.mxu3 %v2957_v43  ;;  %v3025_v43 = vld [vmem:[#allocation5 + $0x4e8] sm:$0xff] }
  0x6b   :  { %1765 = vmatpush.bf16.msra.mxu0 %v2932_v44  ;;  %v3000_v44 = vld [vmem:[#allocation5 + $0x420] sm:$0xff] }
  0x6c   :  { %1778 = vmatpush.bf16.msra.mxu1 %v2940_v45  ;;  %v3008_v45 = vld [vmem:[#allocation5 + $0x460] sm:$0xff] }
  0x6d   :  { %1791 = vmatpush.bf16.msra.mxu2 %v2948_v46  ;;  %v3016_v46 = vld [vmem:[#allocation5 + $0x4a0] sm:$0xff] }
  0x6e   :  { %1804 = vmatpush.bf16.msra.mxu3 %v2956_v47  ;;  %1766 = vmatmul.bf16.vlgmr.msra.gmra.mxu0 %v98_v56  ;;  %v3024_v47 = vld [vmem:[#allocation5 + $0x4e0] sm:$0xff]  ;;  %v2997_v56 = vld [vmem:[#allocation5 + $0x408] sm:$0xff] }
  0x6f   :  { %1810 = vmatpush.bf16.msrb.mxu0 %v2971_v48  ;;  %1779 = vmatmul.bf16.vlgmr.msra.gmra.mxu1 %v99_v58  ;;  %v2999_v48 = vld [vmem:[#allocation5 + $0x418] sm:$0xff]  ;;  %v3013_v58 = vld [vmem:[#allocation5 + $0x488] sm:$0xff] }
  0x70   :  { %1823 = vmatpush.bf16.msrb.mxu1 %v2979_v51  ;;  %1792 = vmatmul.bf16.vlgmr.msra.gmra.mxu2 %v100_v57  ;;  %v3023_v51 = vld [vmem:[#allocation5 + $0x4d8] sm:$0xff]  ;;  %v3005_v57 = vld [vmem:[#allocation5 + $0x448] sm:$0xff] }
  0x71   :  { %1836 = vmatpush.bf16.msrb.mxu2 %v2987_v54  ;;  %1805 = vmatmul.bf16.vlgmr.msra.gmra.mxu3 %v101_v59  ;;  %v3014_v54 = vld [vmem:[#allocation5 + $0x490] sm:$0xff]  ;;  %v3021_v59 = vld [vmem:[#allocation5 + $0x4c8] sm:$0xff] }
  0x72   :  { %1849 = vmatpush.bf16.msrb.mxu3 %v2995_v55  ;;  %v3022_v55 = vld [vmem:[#allocation5 + $0x4d0] sm:$0xff] }
  0x73   :  { %1811 = vmatpush.bf16.msrb.mxu0 %v2970_v60  ;;  %v2996_v60 = vld [vmem:[#allocation5 + $0x400] sm:$0xff] }
  0x74   :  { %1824 = vmatpush.bf16.msrb.mxu1 %v2978_v61  ;;  %v3004_v61 = vld [vmem:[#allocation5 + $0x440] sm:$0xff] }
  0x75   :  { %1837 = vmatpush.bf16.msrb.mxu2 %v2986_v62  ;;  %v3012_v62 = vld [vmem:[#allocation5 + $0x480] sm:$0xff] }
  0x76   :  { %1850 = vmatpush.bf16.msrb.mxu3 %v2994_v63  ;;  %v3020_v63 = vld [vmem:[#allocation5 + $0x4c0] sm:$0xff] }
  0x77   :  { %1812 = vmatpush.bf16.msrb.mxu0 %v2969_v0  ;;  %v3035_v0 = vld [vmem:[#allocation5 + $0x538] sm:$0xff] }
  0x78   :  { %1825 = vmatpush.bf16.msrb.mxu1 %v2977_v1  ;;  %v82_v1 = vld [vmem:[#allocation2 + $0x80] sm:$0xff] }
  0x79   :  { %1838 = vmatpush.bf16.msrb.mxu2 %v2985_v2  ;;  %v84_v2 = vld [vmem:[#allocation2 + $0x90] sm:$0xff] }
  0x7a   :  { %1851 = vmatpush.bf16.msrb.mxu3 %v2993_v3  ;;  %v3043_v3 = vld [vmem:[#allocation5 + $0x578] sm:$0xff] }
  0x7b   :  { %1813 = vmatpush.bf16.msrb.mxu0 %v2968_v4  ;;  %v83_v4 = vld [vmem:[#allocation2 + $0x88] sm:$0xff] }
  0x7c   :  { %1826 = vmatpush.bf16.msrb.mxu1 %v2976_v5  ;;  %v85_v5 = vld [vmem:[#allocation2 + $0x98] sm:$0xff] }
  0x7d   :  { %1839 = vmatpush.bf16.msrb.mxu2 %v2984_v6  ;;  %v3051_v6 = vld [vmem:[#allocation5 + $0x5b8] sm:$0xff] }
  0x7e   :  { %1852 = vmatpush.bf16.msrb.mxu3 %v2992_v7  ;;  %v3059_v7 = vld [vmem:[#allocation5 + $0x5f8] sm:$0xff] }
  0x7f   :  { %1814 = vmatpush.bf16.msrb.mxu0 %v2967_v8  ;;  %v106_v8 = vpack.c.bf16 %v82_v1, %v82_v1 }
  0x80   :  { %1827 = vmatpush.bf16.msrb.mxu1 %v2975_v9  ;;  %v108_v9 = vpack.c.bf16 %v84_v2, %v84_v2 }
  0x81   :  { %1840 = vmatpush.bf16.msrb.mxu2 %v2983_v10  ;;  %v107_v10 = vpack.c.bf16 %v83_v4, %v83_v4 }
  0x82   :  { %1853 = vmatpush.bf16.msrb.mxu3 %v2991_v11  ;;  %v109_v11 = vpack.c.bf16 %v85_v5, %v85_v5 }
  0x83   :  { %1815 = vmatpush.bf16.msrb.mxu0 %v2966_v12  ;;  %v3034_v12 = vld [vmem:[#allocation5 + $0x530] sm:$0xff] }
  0x84   :  { %1828 = vmatpush.bf16.msrb.mxu1 %v2974_v13  ;;  %v3042_v13 = vld [vmem:[#allocation5 + $0x570] sm:$0xff] }
  0x85   :  { %1841 = vmatpush.bf16.msrb.mxu2 %v2982_v14  ;;  %v3050_v14 = vld [vmem:[#allocation5 + $0x5b0] sm:$0xff] }
  0x86   :  { %1854 = vmatpush.bf16.msrb.mxu3 %v2990_v15  ;;  %v3058_v15 = vld [vmem:[#allocation5 + $0x5f0] sm:$0xff] }
  0x87   :  { %1816 = vmatpush.bf16.msrb.mxu0 %v2965_v16  ;;  %v3033_v16 = vld [vmem:[#allocation5 + $0x528] sm:$0xff] }
  0x88   :  { %1829 = vmatpush.bf16.msrb.mxu1 %v2973_v17  ;;  %v3041_v17 = vld [vmem:[#allocation5 + $0x568] sm:$0xff] }
  0x89   :  { %1842 = vmatpush.bf16.msrb.mxu2 %v2981_v18  ;;  %v3074_v18 = vld [vmem:[%s3234_s2] ss:$0 sm:$0xff] }
  0x8a   :  { %1855 = vmatpush.bf16.msrb.mxu3 %v2989_v19  ;;  %v3049_v19 = vld [vmem:[#allocation5 + $0x5a8] sm:$0xff] }
  0x8b   :  { %1817 = vmatpush.bf16.msrb.mxu0 %v2964_v20  ;;  %v3057_v20 = vld [vmem:[#allocation5 + $0x5e8] sm:$0xff] }
  0x8c   :  { %1830 = vmatpush.bf16.msrb.mxu1 %v2972_v21 }
  0x8d   :  { %1843 = vmatpush.bf16.msrb.mxu2 %v2980_v22  ;;  %v3032_v22 = vld [vmem:[#allocation5 + $0x520] sm:$0xff] }
  0x8e   :  { %1856 = vmatpush.bf16.msrb.mxu3 %v2988_v23  ;;  %1818 = vmatmul.bf16.vlgmr.msrb.gmra.mxu0 %v102_v32  ;;  %v3040_v23 = vld [vmem:[#allocation5 + $0x560] sm:$0xff]  ;;  %v3055_v32 = vld [vmem:[#allocation5 + $0x5d8] sm:$0xff] }
  0x8f   :  { %1862 = vmatpush.bf16.msra.mxu0 %v3003_v24  ;;  %1831 = vmatmul.bf16.vlgmr.msrb.gmra.mxu1 %v103_v34 }
  0x90   :  { %1875 = vmatpush.bf16.msra.mxu1 %v3011_v27  ;;  %1844 = vmatmul.bf16.vlgmr.msrb.gmra.mxu2 %v104_v33  ;;  %v3056_v27 = vld [vmem:[#allocation5 + $0x5e0] sm:$0xff] }
  0x91   :  { %1888 = vmatpush.bf16.msra.mxu2 %v3019_v30  ;;  %1857 = vmatmul.bf16.vlgmr.msrb.gmra.mxu3 %v105_v35  ;;  %v3039_v30 = vld [vmem:[#allocation5 + $0x558] sm:$0xff] }
  0x92   :  { %1901 = vmatpush.bf16.msra.mxu3 %v3027_v31  ;;  %v3047_v31 = vld [vmem:[#allocation5 + $0x598] sm:$0xff] }
  0x93   :  { %1863 = vmatpush.bf16.msra.mxu0 %v3002_v36 }
  0x94   :  { %1876 = vmatpush.bf16.msra.mxu1 %v3010_v37  ;;  %v3030_v37 = vld [vmem:[#allocation5 + $0x510] sm:$0xff] }
  0x95   :  { %1889 = vmatpush.bf16.msra.mxu2 %v3018_v38  ;;  %v3038_v38 = vld [vmem:[#allocation5 + $0x550] sm:$0xff] }
  0x96   :  { %1902 = vmatpush.bf16.msra.mxu3 %v3026_v39 }
  0x97   :  { %1864 = vmatpush.bf16.msra.mxu0 %v3001_v40 }
  0x98   :  { %1877 = vmatpush.bf16.msra.mxu1 %v3009_v41  ;;  %v3046_v41 = vld [vmem:[#allocation5 + $0x590] sm:$0xff] }
  0x99   :  { %1890 = vmatpush.bf16.msra.mxu2 %v3017_v42  ;;  %v3054_v42 = vld [vmem:[#allocation5 + $0x5d0] sm:$0xff] }
  0x9a   :  { %1903 = vmatpush.bf16.msra.mxu3 %v3025_v43  ;;  %v3029_v43 = vld [vmem:[#allocation5 + $0x508] sm:$0xff] }
  0x9b   :  { %1865 = vmatpush.bf16.msra.mxu0 %v3000_v44  ;;  %v3037_v44 = vld [vmem:[#allocation5 + $0x548] sm:$0xff] }
  0x9c   :  { %1878 = vmatpush.bf16.msra.mxu1 %v3008_v45  ;;  %v3045_v45 = vld [vmem:[#allocation5 + $0x588] sm:$0xff] }
  0x9d   :  { %1891 = vmatpush.bf16.msra.mxu2 %v3016_v46  ;;  %v3053_v46 = vld [vmem:[#allocation5 + $0x5c8] sm:$0xff] }
  0x9e   :  { %1904 = vmatpush.bf16.msra.mxu3 %v3024_v47 }
  0x9f   :  { %1866 = vmatpush.bf16.msra.mxu0 %v2999_v48 }
  0xa0   :  { %1879 = vmatpush.bf16.msra.mxu1 %v3007_v49  ;;  %v3028_v49 = vld [vmem:[#allocation5 + $0x500] sm:$0xff] }
  0xa1   :  { %1892 = vmatpush.bf16.msra.mxu2 %v3015_v50  ;;  %v3036_v50 = vld [vmem:[#allocation5 + $0x540] sm:$0xff] }
  0xa2   :  { %1905 = vmatpush.bf16.msra.mxu3 %v3023_v51  ;;  %v3044_v51 = vld [vmem:[#allocation5 + $0x580] sm:$0xff] }
  0xa3   :  { %1867 = vmatpush.bf16.msra.mxu0 %v2998_v52  ;;  %v86_v52 = vld [vmem:[#allocation2 + $0xa0] sm:$0xff] }
  0xa4   :  { %1880 = vmatpush.bf16.msra.mxu1 %v3006_v53  ;;  %v87_v53 = vld [vmem:[#allocation2 + $0xa8] sm:$0xff] }
  0xa5   :  { %1893 = vmatpush.bf16.msra.mxu2 %v3014_v54  ;;  %v3052_v54 = vld [vmem:[#allocation5 + $0x5c0] sm:$0xff] }
  0xa6   :  { %1906 = vmatpush.bf16.msra.mxu3 %v3022_v55  ;;  %v88_v55 = vld [vmem:[#allocation2 + $0xb0] sm:$0xff] }
  0xa7   :  { %1868 = vmatpush.bf16.msra.mxu0 %v2997_v56  ;;  %v89_v56 = vld [vmem:[#allocation2 + $0xb8] sm:$0xff] }
  0xa8   :  { %1881 = vmatpush.bf16.msra.mxu1 %v3005_v57  ;;  %v110_v57 = vpack.c.bf16 %v86_v52, %v86_v52 }
  0xa9   :  { %1894 = vmatpush.bf16.msra.mxu2 %v3013_v58  ;;  %v111_v58 = vpack.c.bf16 %v87_v53, %v87_v53 }
  0xaa   :  { %1907 = vmatpush.bf16.msra.mxu3 %v3021_v59  ;;  %v112_v59 = vpack.c.bf16 %v88_v55, %v88_v55 }
  0xab   :  { %1869 = vmatpush.bf16.msra.mxu0 %v2996_v60  ;;  %v1663_v21 = vpop.f32.mrf.mxu0  ;;  %v113_v60 = vpack.c.bf16 %v89_v56, %v89_v56 }
  0xac   :  { %1882 = vmatpush.bf16.msra.mxu1 %v3004_v61  ;;  %v1664_v24 = vadd.f32 %v3074_v18, %v1663_v21  ;;  %v1676_v25 = vpop.f32.mrf.mxu1 }
  0xad   :  { %1895 = vmatpush.bf16.msra.mxu2 %v3012_v62 }
  0xae   :  { %1908 = vmatpush.bf16.msra.mxu3 %v3020_v63  ;;  %1870 = vmatmul.bf16.vlgmr.msra.gmra.mxu0 %v106_v8  ;;  %v1677_v28 = vadd.f32 %v1676_v25, %v1664_v24  ;;  %v3067_v25 = vld [vmem:[#allocation7 + $0x38] sm:$0xff] }
  0xaf   :  { %1914 = vmatpush.bf16.msrb.mxu0 %v3035_v0  ;;  %1883 = vmatmul.bf16.vlgmr.msra.gmra.mxu1 %v107_v10 }
  0xb0   :  { %1927 = vmatpush.bf16.msrb.mxu1 %v3043_v3  ;;  %1896 = vmatmul.bf16.vlgmr.msra.gmra.mxu2 %v108_v9 }
  0xb1   :  { %1940 = vmatpush.bf16.msrb.mxu2 %v3051_v6  ;;  %1909 = vmatmul.bf16.vlgmr.msra.gmra.mxu3 %v109_v11 }
  0xb2   :  { %1953 = vmatpush.bf16.msrb.mxu3 %v3059_v7 }
  0xb3   :  { %1915 = vmatpush.bf16.msrb.mxu0 %v3034_v12  ;;  %v1689_v33 = vpop.f32.mrf.mxu2  ;;  %v1665_v36 = vpop.f32.mrf.mxu0 }
  0xb4   :  { %1928 = vmatpush.bf16.msrb.mxu1 %v3042_v13  ;;  %v1690_v34 = vadd.f32 %v1689_v33, %v1677_v28  ;;  %v1702_v35 = vpop.f32.mrf.mxu3  ;;  %v1678_v40 = vpop.f32.mrf.mxu1  ;;  %v3066_v28 = vld [vmem:[#allocation7 + $0x30] sm:$0xff]  ;;  %v3063_v33 = vld [vmem:[#allocation7 + $0x18] sm:$0xff] }
  0xb5   :  { %1941 = vmatpush.bf16.msrb.mxu2 %v3050_v14 }
  0xb6   :  { %1954 = vmatpush.bf16.msrb.mxu3 %v3058_v15  ;;  %v1703_v39 = vadd.f32 %v1702_v35, %v1690_v34  ;;  %v3062_v35 = vld [vmem:[#allocation7 + $0x10] sm:$0xff] }
  0xb7   :  { %1916 = vmatpush.bf16.msrb.mxu0 %v3033_v16 }
  0xb8   :  { %1929 = vmatpush.bf16.msrb.mxu1 %v3041_v17 }
  0xb9   :  { %1942 = vmatpush.bf16.msrb.mxu2 %v3049_v19 }
  0xba   :  { %1955 = vmatpush.bf16.msrb.mxu3 %v3057_v20 }
  0xbb   :  { %1917 = vmatpush.bf16.msrb.mxu0 %v3032_v22  ;;  %v1691_v47 = vpop.f32.mrf.mxu2 }
  0xbc   :  { %1930 = vmatpush.bf16.msrb.mxu1 %v3040_v23  ;;  %v1704_v48 = vpop.f32.mrf.mxu3 }
  0xbd   :  { %1943 = vmatpush.bf16.msrb.mxu2 %v3048_v26 }
  0xbe   :  { %1956 = vmatpush.bf16.msrb.mxu3 %v3056_v27 }
  0xbf   :  { %1918 = vmatpush.bf16.msrb.mxu0 %v3031_v29  ;;  %v3065_v29 = vld [vmem:[#allocation7 + $0x28] sm:$0xff] }
  0xc0   :  { %1931 = vmatpush.bf16.msrb.mxu1 %v3039_v30 }
  0xc1   :  { %1944 = vmatpush.bf16.msrb.mxu2 %v3047_v31 }
  0xc2   :  { %1957 = vmatpush.bf16.msrb.mxu3 %v3055_v32  ;;  %v3064_v32 = vld [vmem:[#allocation7 + $0x20] sm:$0xff] }
  0xc3   :  { %1919 = vmatpush.bf16.msrb.mxu0 %v3030_v37  ;;  %v3061_v37 = vld [vmem:[#allocation7 + $0x8] sm:$0xff] }
  0xc4   :  { %1932 = vmatpush.bf16.msrb.mxu1 %v3038_v38 }
  0xc5   :  { %1945 = vmatpush.bf16.msrb.mxu2 %v3046_v41 }
  0xc6   :  { %1958 = vmatpush.bf16.msrb.mxu3 %v3054_v42  ;;  %v3060_v42 = vld [vmem:[#allocation7] sm:$0xff] }
  0xc7   :  { %1920 = vmatpush.bf16.msrb.mxu0 %v3029_v43 }
  0xc8   :  { %1933 = vmatpush.bf16.msrb.mxu1 %v3037_v44 }
  0xc9   :  { %1946 = vmatpush.bf16.msrb.mxu2 %v3045_v45 }
  0xca   :  { %1959 = vmatpush.bf16.msrb.mxu3 %v3053_v46 }
  0xcb   :  { %1921 = vmatpush.bf16.msrb.mxu0 %v3028_v49  ;;  %v1715_v61 = vpop.f32.mrf.mxu0 }
  0xcc   :  { %1934 = vmatpush.bf16.msrb.mxu1 %v3036_v50  ;;  %v1716_v62 = vadd.f32 %v1715_v61, %v1703_v39  ;;  %v1728_v63 = vpop.f32.mrf.mxu1 }
  0xcd   :  { %1947 = vmatpush.bf16.msrb.mxu2 %v3044_v51 }
  0xce   :  { %1960 = vmatpush.bf16.msrb.mxu3 %v3052_v54  ;;  %1922 = vmatmul.bf16.vlgmr.msrb.gmra.mxu0 %v110_v57  ;;  %v1729_v0 = vadd.f32 %v1728_v63, %v1716_v62 }
  0xcf   :  { %1935 = vmatmul.bf16.vlgmr.msrb.gmra.mxu1 %v111_v58  ;;  %2036 = vmatpush.bf16.msra.mxu0 %v3067_v25 }
  0xd0   :  { %1948 = vmatmul.bf16.vlgmr.msrb.gmra.mxu2 %v112_v59 }
  0xd1   :  { %1961 = vmatmul.bf16.vlgmr.msrb.gmra.mxu3 %v113_v60 }
  0xd3   :  { %v1741_v1 = vpop.f32.mrf.mxu2  ;;  %v1717_v4 = vpop.f32.mrf.mxu0  ;;  %2037 = vmatpush.bf16.msra.mxu0 %v3066_v28 }
  0xd4   :  { %v1742_v2 = vadd.f32 %v1741_v1, %v1729_v0  ;;  %v1754_v3 = vpop.f32.mrf.mxu3  ;;  %v1730_v6 = vpop.f32.mrf.mxu1 }
  0xd6   :  { %v1755_v5 = vadd.f32 %v1754_v3, %v1742_v2  ;;  %v3075_v3 = vld [vmem:[%s3236_s4] ss:$0 sm:$0xff] }
  0xd7   :  { %2038 = vmatpush.bf16.msra.mxu0 %v3065_v29 }
  0xdb   :  { %v1743_v7 = vpop.f32.mrf.mxu2  ;;  %2039 = vmatpush.bf16.msra.mxu0 %v3064_v32 }
  0xdc   :  { %v1756_v8 = vpop.f32.mrf.mxu3 }
  0xdf   :  { %2040 = vmatpush.bf16.msra.mxu0 %v3063_v33 }
  0xe3   :  { %2041 = vmatpush.bf16.msra.mxu0 %v3062_v35 }
  0xe7   :  { %2042 = vmatpush.bf16.msra.mxu0 %v3061_v37 }
  0xeb   :  { %v1767_v9 = vpop.f32.mrf.mxu0  ;;  %2043 = vmatpush.bf16.msra.mxu0 %v3060_v42 }
  0xec   :  { %v1768_v10 = vadd.f32 %v1767_v9, %v1755_v5  ;;  %v1780_v11 = vpop.f32.mrf.mxu1 }
  0xee   :  { %v1781_v12 = vadd.f32 %v1780_v11, %v1768_v10 }
  0xf3   :  { %v1793_v13 = vpop.f32.mrf.mxu2  ;;  %v1769_v16 = vpop.f32.mrf.mxu0 }
  0xf4   :  { %v1794_v14 = vadd.f32 %v1793_v13, %v1781_v12  ;;  %v1806_v15 = vpop.f32.mrf.mxu3  ;;  %v1782_v18 = vpop.f32.mrf.mxu1 }
  0xf6   :  { %v1807_v17 = vadd.f32 %v1806_v15, %v1794_v14 }
  0xfb   :  { %v1795_v19 = vpop.f32.mrf.mxu2 }
  0xfc   :  { %v1808_v20 = vpop.f32.mrf.mxu3 }
 0x10b   :  { %v1819_v21 = vpop.f32.mrf.mxu0 }
 0x10c   :  { %v1832_v22 = vpop.f32.mrf.mxu1  ;;  %v1820_v39 = vadd.f32 %v1819_v21, %v1807_v17 }
 0x10e   :  { %v1833_v44 = vadd.f32 %v1832_v22, %v1820_v39 }
 0x113   :  { %v1845_v23 = vpop.f32.mrf.mxu2  ;;  %v1821_v26 = vpop.f32.mrf.mxu0 }
 0x114   :  { %v1858_v24 = vpop.f32.mrf.mxu3  ;;  %v1834_v27 = vpop.f32.mrf.mxu1  ;;  %v1846_v45 = vadd.f32 %v1845_v23, %v1833_v44 }
 0x116   :  { %v1859_v48 = vadd.f32 %v1858_v24, %v1846_v45 }
 0x11b   :  { %v1847_v30 = vpop.f32.mrf.mxu2 }
 0x11c   :  { %v1860_v31 = vpop.f32.mrf.mxu3 }
 0x12b   :  { %v1871_v34 = vpop.f32.mrf.mxu0 }
 0x12c   :  { %v1884_v36 = vpop.f32.mrf.mxu1  ;;  %v1872_v49 = vadd.f32 %v1871_v34, %v1859_v48 }
 0x12e   :  { %v1885_v50 = vadd.f32 %v1884_v36, %v1872_v49 }
 0x133   :  { %v1897_v38 = vpop.f32.mrf.mxu2  ;;  %v1873_v41 = vpop.f32.mrf.mxu0 }
 0x134   :  { %v1910_v40 = vpop.f32.mrf.mxu3  ;;  %v1886_v43 = vpop.f32.mrf.mxu1  ;;  %v1898_v51 = vadd.f32 %v1897_v38, %v1885_v50 }
 0x136   :  { %v1911_v52 = vadd.f32 %v1910_v40, %v1898_v51 }
 0x13b   :  { %v1899_v46 = vpop.f32.mrf.mxu2 }
 0x13c   :  { %v1912_v47 = vpop.f32.mrf.mxu3 }
 0x14b   :  { %v1923_v53 = vpop.f32.mrf.mxu0 }
 0x14c   :  { %v1936_v54 = vpop.f32.mrf.mxu1  ;;  %v1924_v55 = vadd.f32 %v1923_v53, %v1911_v52 }
 0x14e   :  { %v1937_v56 = vadd.f32 %v1936_v54, %v1924_v55 }
 0x153   :  { %v1949_v57 = vpop.f32.mrf.mxu2  ;;  %v1925_v60 = vpop.f32.mrf.mxu0 }
 0x154   :  { %v1962_v58 = vpop.f32.mrf.mxu3  ;;  %v1950_v59 = vadd.f32 %v1949_v57, %v1937_v56  ;;  %v1938_v61 = vpop.f32.mrf.mxu1 }
 0x156   :  { %v1963_v62 = vadd.f32 %v1962_v58, %v1950_v59 }
 0x158   :  { %v1966_v63 = vmax.f32 %v1963_v62, 0.0 }
 0x15a   :  { %v1967_v0 = vpack.c.bf16 %v1966_v63, %v1966_v63 }
 0x15b   :  { %v1951_v1 = vpop.f32.mrf.mxu2 }
 0x15c   :  { %v1964_v2 = vpop.f32.mrf.mxu3  ;;  %2044 = vmatmul.bf16.vlgmr.msra.gmra.mxu0 %v1967_v0 }
 0x1d9   :  { %v2045_v4 = vpop.f32.mrf.mxu0 }
 0x1da   :  { %v2046_v5 = vadd.f32 %v3075_v3, %v2045_v4 }
 0x1dc   :  { %2049 = vst [vmem:[#allocation8] sm:$0xff] %v2046_v5 }
 0x1dd   :  { %2060 = dma.vmem_to_hbm [thread:$0]  %s2056_s11, 128, %s2058_s14, [#allocation4]  }
 0x1e1   :  { %v2047_v6 = vpop.f32.mrf.mxu0 }
 0x1e2   :  { %3176 = dma.done.wait [#allocation4], 128  }
 0x1e3   :  { %3177 = vsyncadd [#allocation4], 4294967168 }
 0x1e4   :  { %2065 = vsyncpa [#allocation3], 1 }
 0x1e5   :  { %2066 = vsyncpa [#allocation6], 1 }
 0x1e6   :  { %2067 = vsyncpa [#allocation4], 1 }

</bundles_post_ra>
